<compile_context>
chip_gen: v5e
topology: v5e:2x2
jax: 0.10.0
libtpu: 0.0.40
codegen_flags: <defaults>
</compile_context>

<pallas_src>
import math

import jax
import jax.numpy as jnp
from jax.experimental import pallas as pl
from jax.experimental.pallas import tpu as pltpu


def _round_up(n, m):
    return ((n + m - 1) // m) * m


def _choose_batch_tile(batch, features, itemsize, x_budget_bytes=16 * 1024 * 1024):
    """Largest batch tile (multiple of 8, <= 1024 rows) whose double-buffered
    x tile fits a conservative VMEM budget valid on v5e/v6e/v7x."""
    tb = min(1024, _round_up(batch, 8))
    while tb > 8 and 2 * tb * features * itemsize > x_budget_bytes:
        tb = max(8, _round_up(tb // 2, 8))
    return tb


def _linear_kernel(x_ref, w_ref, b_ref, o_ref):
    # x_ref: (TB, F) VMEM tile; w_ref: (1, F) VMEM (resident); b_ref: (1,) SMEM.
    x = x_ref[...].astype(jnp.float32)
    w = w_ref[...].astype(jnp.float32)
    # VPU broadcast-multiply + lane reduction (matvec). Avoids a 1-output-
    # column MXU matmul and its per-tile result-FIFO drain.
    acc = jnp.sum(x * w, axis=-1, keepdims=True)        # (TB, 1) f32
    o_ref[...] = (acc + b_ref[0]).astype(o_ref.dtype)


def pmodel_forward(x, weight, bias, *, batch_tile=None):
    """y = x @ weight.T + bias  (PyTorch nn.Linear(F, 1) semantics).

    x:      [B, F]
    weight: [1, F]  (PyTorch layout; no pre-transpose needed)
    bias:   [1]
    returns [B, 1]
    """
    B, F = x.shape
    assert weight.shape == (1, F), weight.shape
    bias = jnp.asarray(bias).reshape(1).astype(x.dtype)

    itemsize = jnp.dtype(x.dtype).itemsize
    if batch_tile is None:
        batch_tile = _choose_batch_tile(B, F, itemsize)
    tb = max(8, _round_up(min(batch_tile, _round_up(B, 8)), 8))
    num_tiles = pl.cdiv(B, tb)
    b_pad = num_tiles * tb
    if b_pad != B:
        # Remainder handling: zero-pad the batch, slice the result afterwards.
        x = jnp.pad(x, ((0, b_pad - B), (0, 0)))

    cost = pl.CostEstimate(
        flops=2 * b_pad * F,
        transcendentals=0,
        bytes_accessed=itemsize * (b_pad * F + F + b_pad + 1),
    )

    out = pl.pallas_call(
        _linear_kernel,
        out_shape=jax.ShapeDtypeStruct((b_pad, 1), x.dtype),
        grid_spec=pltpu.PrefetchScalarGridSpec(
            num_scalar_prefetch=0,
            grid=(num_tiles,),
            in_specs=[
                # x: batch-tiled -> double-buffered/pipelined by Pallas.
                pl.BlockSpec((tb, F), lambda i: (i, 0)),
                # weight: constant block -> DMA'd once, resident in VMEM.
                pl.BlockSpec((1, F), lambda i: (0, 0)),
                # bias: single scalar, lives in SMEM.
                pl.BlockSpec(memory_space=pltpu.MemorySpace.SMEM),
            ],
            out_specs=pl.BlockSpec((tb, 1), lambda i: (i, 0)),
        ),
        compiler_params=pltpu.CompilerParams(
            # Batch rows are independent -> parallel axis (2 TCs on v7x).
            dimension_semantics=("parallel",),
            # Explicit scoped-VMEM limit with headroom; the tile budget above
            # keeps 2 x TB x F x itemsize well under this on every generation.
            vmem_limit_bytes=32 * 1024 * 1024,
        ),
        cost_estimate=cost,
    )(x, weight, bias)

    return out[:B]


def init_params(key, in_features, out_features=1):
    # Mirrors nn.Linear defaults: weight, bias ~ U(-1/sqrt(F), 1/sqrt(F)).
    kw, kb = jax.random.split(key)
    bound = 1.0 / math.sqrt(in_features)
    weight = jax.random.uniform(
        kw, (out_features, in_features), jnp.float32, -bound, bound
    )
    bias = jax.random.uniform(kb, (out_features,), jnp.float32, -bound, bound)
    return weight, bias  # PyTorch layouts: [1, F] and [1]


if __name__ == "__main__":
    key = jax.random.PRNGKey(0)
    k_x1, k_p1, k_x2, k_p2 = jax.random.split(key, 4)

    # Case 1: multi-tile grid with a batch that needs remainder padding
    # (exercises pipelining, the parallel batch axis, and pad/slice).
    B1, F1 = 200, 64
    x1 = jax.random.normal(k_x1, (B1, F1), jnp.float32)
    w1, b1 = init_params(k_p1, F1)
    y1 = jax.block_until_ready(pmodel_forward(x1, w1, b1, batch_tile=64))
    ref1 = x1 @ w1.T + b1
    assert y1.shape == (B1, 1)
    assert jnp.allclose(y1, ref1, atol=1e-5, rtol=1e-5)

    # Case 2: tiny shape with automatic tile selection (single grid step).
    B2, F2 = 8, 32
    x2 = jax.random.normal(k_x2, (B2, F2), jnp.float32)
    w2, b2 = init_params(k_p2, F2)
    y2 = jax.block_until_ready(pmodel_forward(x2, w2, b2))
    ref2 = x2 @ w2.T + b2
    assert y2.shape == (B2, 1)
    assert jnp.allclose(y2, ref2, atol=1e-5, rtol=1e-5)

    print("KERNEL_OK")
</pallas_src>

<mosaic_0001>
module attributes {stable_mosaic.version = 11 : i64} {
  func.func @_linear_kernel(%arg0: i32, %arg1: memref<64x64xf32, #tpu.memory_space<vmem>>, %arg2: memref<1x64xf32, #tpu.memory_space<vmem>>, %arg3: memref<1xf32, #tpu.memory_space<smem>>, %arg4: memref<64x1xf32, #tpu.memory_space<vmem>>) attributes {dimension_semantics = [#tpu.dimension_semantics<parallel>], iteration_bounds = array<i64: 4>, scalar_prefetch = 0 : i64, scratch_operands = 0 : i64, tpu.core_type = #tpu.core_type<tc>, window_params = [{transform_indices = @transform_0, window_bounds = array<i64: 64, 64>}, {pipeline_mode = #tpu.pipeline_mode<synchronous>, transform_indices = @transform_1, window_bounds = array<i64: 1, 64>}, {transform_indices = @transform_2, window_bounds = array<i64: 1>}, {transform_indices = @transform_3, window_bounds = array<i64: 64, 1>}]} {
    %c0 = arith.constant 0 : index
    %c0_0 = arith.constant 0 : index
    %0 = vector.load %arg1[%c0, %c0_0] : memref<64x64xf32, #tpu.memory_space<vmem>>, vector<64x64xf32>
    %c0_1 = arith.constant 0 : index
    %c0_2 = arith.constant 0 : index
    %1 = vector.load %arg2[%c0_1, %c0_2] : memref<1x64xf32, #tpu.memory_space<vmem>>, vector<1x64xf32>
    %2 = vector.broadcast %1 : vector<1x64xf32> to vector<64x64xf32>
    %3 = arith.mulf %0, %2 : vector<64x64xf32>
    %cst = arith.constant dense<0.000000e+00> : vector<64xf32>
    %4 = vector.multi_reduction <add>, %3, %cst [1] : vector<64x64xf32> to vector<64xf32>
    %5 = vector.shape_cast %4 : vector<64xf32> to vector<64x1xf32>
    %c0_3 = arith.constant 0 : index
    %6 = memref.load %arg3[%c0_3] : memref<1xf32, #tpu.memory_space<smem>>
    %7 = vector.broadcast %6 : f32 to vector<64x1xf32>
    %8 = arith.addf %5, %7 : vector<64x1xf32>
    %c0_4 = arith.constant 0 : index
    %c0_5 = arith.constant 0 : index
    %9 = vector.load %arg4[%c0_4, %c0_5] : memref<64x1xf32, #tpu.memory_space<vmem>>, vector<64x1xf32>
    tpu.vector_store %arg4[%c0_4, %c0_5], %8 {strides = array<i32>} : memref<64x1xf32, #tpu.memory_space<vmem>>, vector<64x1xf32>,
    return
  }
  func.func @transform_0(%arg0: i32) -> (i32, i32) {
    %c0_i32 = arith.constant 0 : i32
    %c0_i32_0 = arith.constant 0 : i32
    return %arg0, %c0_i32 : i32, i32
  }
  func.func @transform_1(%arg0: i32) -> (i32, i32) {
    %c0_i32 = arith.constant 0 : i32
    %c0_i32_0 = arith.constant 0 : i32
    %c0_i32_1 = arith.constant 0 : i32
    return %c0_i32, %c0_i32_0 : i32, i32
  }
  func.func @transform_2(%arg0: i32) -> i32 {
    %c0_i32 = arith.constant 0 : i32
    %c0_i32_0 = arith.constant 0 : i32
    return %c0_i32 : i32
  }
  func.func @transform_3(%arg0: i32) -> (i32, i32) {
    %c0_i32 = arith.constant 0 : i32
    %c0_i32_0 = arith.constant 0 : i32
    return %arg0, %c0_i32 : i32, i32
  }
}

</mosaic_0001>

<bundles_post_ra>
// kernel: tpu_custom_call.1
= control target key start
LH: loop header
LB: loop body
LE: loop exit
PB: predicated region body
PF: predicated region fallthrough
CT: control target
= control target key end

     0   :  { %s346_s14 = smov 0   ;;  %s389_s0 = inlined_call_operand.vmem [shape: f32[256,64], index: 0, kind: input, shape index: {}]   ;;  %s390_s1 = inlined_call_operand.vmem [shape: f32[1,64], index: 1, kind: input, shape index: {}]   ;;  %s391_s2 = inlined_call_operand.<no memory space> [shape: f32[1], index: 2, kind: input, shape index: {}]   ;;  %s392_s3 = inlined_call_operand.vmem [shape: f32[256,1], index: 3, kind: output, shape index: {}]  }
   0x1   :  { %8 = sst [smem:[#allocation2]] %s391_s2 }
   0x2 LB: > { %s295_s15 = sadd.s32 4294967295, %s321_s14   ;;  %p299_p0 = scmp.ge.s32.totalorder %s321_s14, 1  ;;  %s321_s14 = sphi %s346_s14, %s14_s14  }
   0x3   : > { %p139_p1 = scmp.lt.s32.totalorder %s321_s14, 5 }
   0x5   : > { %p140_p2 = pnand %p299_p0, %p139_p1 }
   0x6   : > { %s300_s16 = sshll.u32 (!%p140_p2), %s295_s15, 3  ;;  %s220_s22 = sld [smem:[#allocation2]] (!%p140_p2) }
   0x7   : > { %143 = sbr.rel (%p140_p2) target bundleno = 155 (0x9b), region = 32  ;;  %p164_p3 = scmp.lt.s32.totalorder (!%p140_p2), %s300_s16, 31 }
   0xc   : > { %s394_s16 = smov (!%p164_p3, %s300_s16), 31  ;;  %v314_v0 = vld [vmem:[%s390_s1] ss:$0 sm:$0xff]  ;;  %vm195_vm0 = vcmask 523264   ;;  %v221_v25 = vstv %s220_s22  ;;  %vm230_vm1 = vcmask 7168  }
   0xd   : > { %s301_s18 = sshll.u32 %s394_s16, 3 }
   0xe   : > { %s167_s21 = scalar_lea.vmem %s389_s0, %s301_s18  ;;  %s173_s25 = scalar_lea.vmem %s392_s3, %s301_s18 }
   0xf   : > { %v177_v1 = vld [vmem:[%s167_s21 + $0x10] sm:$0xff]  ;;  %v175_v2 = vld [vmem:[%s167_s21] sm:$0xff]  ;;  %v178_v7 = vld [vmem:[%s167_s21 + $0x18] sm:$0xff] }
  0x10   : > { %v179_v3 = vld [vmem:[%s167_s21 + $0x20] sm:$0xff]  ;;  %v189_v4 = vmul.f32 %v314_v0, %v177_v1  ;;  %v187_v5 = vmul.f32 %v314_v0, %v175_v2  ;;  %v176_v8 = vld [vmem:[%s167_s21 + $0x8] sm:$0xff]  ;;  %v190_v13 = vmul.f32 %v314_v0, %v178_v7  ;;  %v182_v19 = vld [vmem:[%s167_s21 + $0x38] sm:$0xff] }
  0x11   : > { %v191_v6 = vmul.f32 %v314_v0, %v179_v3  ;;  %v180_v12 = vld [vmem:[%s167_s21 + $0x28] sm:$0xff]  ;;  %v188_v14 = vmul.f32 %v314_v0, %v176_v8  ;;  %v181_v20 = vld [vmem:[%s167_s21 + $0x30] sm:$0xff]  ;;  %v194_v21 = vmul.f32 %v314_v0, %v182_v19 }
  0x12   : > { %v202_v9 = vsel %vm195_vm0, %v189_v4, 0.0  ;;  %v196_v10 = vsel %vm195_vm0, %v187_v5, 0.0  ;;  %v192_v15 = vmul.f32 %v314_v0, %v180_v12  ;;  %v205_v16 = vsel %vm195_vm0, %v190_v13, 0.0 }
  0x13   : > { %v208_v11 = vsel %vm195_vm0, %v191_v6, 0.0  ;;  %203 = vadd.xlane.f32.xlu1 %v202_v9  ;;  %197 = vadd.xlane.f32.xlu0 %v196_v10  ;;  %v199_v17 = vsel %vm195_vm0, %v188_v14, 0.0  ;;  %v193_v22 = vmul.f32 %v314_v0, %v181_v20  ;;  %v217_v23 = vsel %vm195_vm0, %v194_v21, 0.0 }
  0x14   : > { %209 = vadd.xlane.f32.xlu2 %v208_v11  ;;  %v211_v18 = vsel %vm195_vm0, %v192_v15, 0.0 }
  0x15   : > { %v214_v24 = vsel %vm195_vm0, %v193_v22, 0.0 }
  0x1b   : > { %206 = vadd.xlane.f32.xlu1 %v205_v16  ;;  %200 = vadd.xlane.f32.xlu0 %v199_v17 }
  0x1c   : > { %212 = vadd.xlane.f32.xlu2 %v211_v18 }
  0x23   : > { %218 = vadd.xlane.f32.xlu1 %v217_v23  ;;  %215 = vadd.xlane.f32.xlu0 %v214_v24 }
  0x86   : > { %v204_v26 = vpop.xlane.xlu1 %203  ;;  %v198_v27 = vpop.xlane.xlu0 %197 }
  0x87   : > { %v224_v28 = vadd.f32 %v221_v25, %v204_v26  ;;  %v222_v29 = vadd.f32 %v221_v25, %v198_v27  ;;  %v210_v30 = vpop.xlane.xlu2 %209 }
  0x88   : > { %v226_v31 = vadd.f32 %v221_v25, %v210_v30 }
  0x89   : > { %233 = vst.msk [vmem:[%s173_s25 + $0x10] sm:$0xff] %vm230_vm1, %v224_v28 }
  0x8a   : > { %231 = vst.msk [vmem:[%s173_s25] sm:$0xff] %vm230_vm1, %v222_v29 }
  0x8b   : > { %235 = vst.msk [vmem:[%s173_s25 + $0x20] sm:$0xff] %vm230_vm1, %v226_v31 }
  0x8e   : > { %v207_v32 = vpop.xlane.xlu1 %206  ;;  %v201_v33 = vpop.xlane.xlu0 %200 }
  0x8f   : > { %v225_v34 = vadd.f32 %v221_v25, %v207_v32  ;;  %v223_v35 = vadd.f32 %v221_v25, %v201_v33  ;;  %v213_v36 = vpop.xlane.xlu2 %212 }
  0x90   : > { %v227_v37 = vadd.f32 %v221_v25, %v213_v36 }
  0x91   : > { %234 = vst.msk [vmem:[%s173_s25 + $0x18] sm:$0xff] %vm230_vm1, %v225_v34 }
  0x92   : > { %232 = vst.msk [vmem:[%s173_s25 + $0x8] sm:$0xff] %vm230_vm1, %v223_v35 }
  0x93   : > { %236 = vst.msk [vmem:[%s173_s25 + $0x28] sm:$0xff] %vm230_vm1, %v227_v37 }
  0x96   : > { %v219_v38 = vpop.xlane.xlu1 %218  ;;  %v216_v39 = vpop.xlane.xlu0 %215 }
  0x97   : > { %v229_v40 = vadd.f32 %v221_v25, %v219_v38  ;;  %v228_v41 = vadd.f32 %v221_v25, %v216_v39 }
  0x99   : > { %238 = vst.msk [vmem:[%s173_s25 + $0x38] sm:$0xff] %vm230_vm1, %v229_v40 }
  0x9a   : > { %237 = vst.msk [vmem:[%s173_s25 + $0x30] sm:$0xff] %vm230_vm1, %v228_v41 }
  0x9b PF: > { %s14_s14 = sadd.s32 1, %s321_s14  }
  0x9c   : > { %p11_p4 = scmp.ge.s32.totalorder %s14_s14, 6  }
  0x9e   :  { %13 = sbr.rel (!%p11_p4) target bundleno = 2 (0x2), region = 62 }

</bundles_post_ra>
